<compile_context>
chip_gen: v5e
topology: v5e:2x2
jax: 0.10.0
libtpu: 0.0.40
codegen_flags: <defaults>
</compile_context>

<pallas_src>
import functools

import jax
import jax.numpy as jnp
import numpy as np
from jax import lax
from jax.experimental import pallas as pl
from jax.experimental.pallas import tpu as pltpu

EPS = 1e-5


# ----------------------------- Pallas kernel -------------------------------

def rsbu_cw_kernel(x_ref, wconv_ref, wfc_ref, pv_ref, aux_ref, out_ref,
                   *, n, hw, row_w):
    # Static shapes:
    #   x_ref / out_ref : (Cp, L)        L = N*H*W; padded channels on sublanes
    #   wconv_ref       : (2, Cp, 3*Cp)  conv1/conv2 mixing matrices, col = k*Cp + cin
    #   wfc_ref         : (2, Cp, Cp)    fc1/fc2 weights in torch (out, in) layout
    #   pv_ref          : (Cp, 8)        cols = [g1, b1, g2, b2, fc1b, g3, b3, fc2b]
    #   aux_ref         : (2+N, L)       rows 0/1 = tap-0 / tap-2 validity masks,
    #                                    rows 2.. = per-sample 0/1 selector
    Cp, L = out_ref.shape
    count2d = float(L)                   # N*H*W elements per channel (BN2d)
    inv_hw = 1.0 / float(hw)

    x = x_ref[...]                       # identity path (mode=0)
    pv = pv_ref[...]
    g1, b1 = pv[:, 0:1], pv[:, 1:2]
    g2, b2 = pv[:, 2:3], pv[:, 3:4]
    fc1b, g3, b3, fc2b = pv[:, 4:5], pv[:, 5:6], pv[:, 6:7], pv[:, 7:8]
    w1 = wconv_ref[0]                    # (Cp, 3Cp)
    w2 = wconv_ref[1]
    wfc1 = wfc_ref[0]                    # (Cp, Cp)
    wfc2 = wfc_ref[1]
    aux = aux_ref[...]
    m0 = aux[0:1, :]                     # (1, L) valid lanes for tap reading h-1
    m2 = aux[1:2, :]                     # (1, L) valid lanes for tap reading h+1
    sel = aux[2:2 + n, :]                # (N, L) 1.0 where lane belongs to sample n

    def bn_fold(v, gamma, beta, count):
        # One-pass BN: fold batch stats into per-channel scale/shift (single FMA apply).
        s1 = jnp.sum(v, axis=1, keepdims=True)
        s2 = jnp.sum(v * v, axis=1, keepdims=True)
        mean = s1 * (1.0 / count)
        var = jnp.maximum(s2 * (1.0 / count) - mean * mean, 0.0)
        scale = gamma * lax.rsqrt(var + EPS)
        shift = beta - mean * scale
        return scale, shift

    def im2col(a):
        # Fused-tap operand for the (3,1) conv with H-padding 1:
        #   row block 0: activation at h-1 (roll toward higher lanes by one image row)
        #   row block 1: activation at h
        #   row block 2: activation at h+1 (roll toward lower lanes; positive shift L-row_w)
        # Edge masks zero the contributions that correspond to the zero padding
        # (and simultaneously kill cross-sample bleed from the wrap-around).
        down = pltpu.roll(a, shift=row_w, axis=1) * m0
        up = pltpu.roll(a, shift=L - row_w, axis=1) * m2
        return jnp.concatenate([down, a, up], axis=0)        # (3Cp, L), sublane-aligned

    # --- BN1 + ReLU, conv1 (one fused-tap batched MXU dot) ---
    sc1, sh1 = bn_fold(x, g1, b1, count2d)
    a1 = jnp.maximum(x * sc1 + sh1, 0.0)
    h = jnp.dot(w1, im2col(a1), preferred_element_type=jnp.float32)   # (Cp, L)

    # --- BN2 + ReLU, conv2 ---
    sc2, sh2 = bn_fold(h, g2, b2, count2d)
    a2 = jnp.maximum(h * sc2 + sh2, 0.0)
    y = jnp.dot(w2, im2col(a2), preferred_element_type=jnp.float32)   # (Cp, L)

    # --- |y| -> per-sample global average pool via selector dot (no concat loop) ---
    abs_y = jnp.abs(y)
    gap = lax.dot_general(abs_y, sel, (((1,), (1,)), ((), ())),
                          preferred_element_type=jnp.float32) * inv_hw  # (Cp, N)

    # --- shrinkage branch: fc1 -> BN1d (batch stats) + ReLU -> fc2 -> sigmoid ---
    s = jnp.dot(wfc1, gap, preferred_element_type=jnp.float32) + fc1b
    sc3, sh3 = bn_fold(s, g3, b3, float(n))
    s = jnp.maximum(s * sc3 + sh3, 0.0)
    s = jnp.dot(wfc2, s, preferred_element_type=jnp.float32) + fc2b
    z = 1.0 / (1.0 + jnp.exp(-s))        # exact sigmoid; tiny (Cp, N), exp on EUP
    thres = gap * z                      # (Cp, N), always >= 0

    # --- broadcast per-(sample,channel) threshold over lanes via selector dot,
    #     then clip-based soft-threshold + identity ---
    t_full = jnp.dot(thres, sel, preferred_element_type=jnp.float32)  # (Cp, L)
    clipped = jnp.minimum(jnp.maximum(y, -t_full), t_full)
    out_ref[...] = y - clipped + x


# ------------------------------- wrapper ------------------------------------

def rsbu_cw_forward(x_nchw, params, stride=1, mode=0):
    assert stride == 1 and mode == 0, "only stride=1, mode=0 implemented"
    (w1, w2, g1, b1, g2, b2, fc1w, fc1b, g3, b3, fc2w, fc2b) = params
    N, C, H, W = x_nchw.shape
    HW = H * W
    L = N * HW
    Cp = ((C + 7) // 8) * 8              # pad channels to a full sublane group
    f32 = jnp.float32

    # NCHW -> (Cp, N*H*W): channels on sublanes (zero-padded), batch*spatial on lanes.
    x_cl = jnp.transpose(x_nchw.astype(f32), (1, 0, 2, 3)).reshape(C, L)
    x_cl = jnp.pad(x_cl, ((0, Cp - C), (0, 0)))

    def pad_vec(v):
        return jnp.pad(v.astype(f32), (0, Cp - C))

    def mix(w):  # canonical (3, Cin, Cout) -> (Cp_out, 3*Cp_in), col = k*Cp + cin
        wp = jnp.pad(w.astype(f32), ((0, 0), (0, Cp - C), (0, Cp - C)))
        return jnp.transpose(wp, (2, 0, 1)).reshape(Cp, 3 * Cp)

    def pad_mat(m):
        return jnp.pad(m.astype(f32), ((0, Cp - C), (0, Cp - C)))

    wconv = jnp.stack([mix(w1), mix(w2)])                              # (2, Cp, 3Cp)
    wfc = jnp.stack([pad_mat(fc1w), pad_mat(fc2w)])                    # (2, Cp, Cp)
    pvec = jnp.stack([pad_vec(g1), pad_vec(b1), pad_vec(g2), pad_vec(b2),
                      pad_vec(fc1b), pad_vec(g3), pad_vec(b3), pad_vec(fc2b)],
                     axis=1)                                           # (Cp, 8)

    # aux rows: [tap-0 validity, tap-2 validity, per-sample selector rows]
    p = jnp.arange(L, dtype=jnp.int32)
    p_in = p % HW
    m0 = (p_in >= W).astype(f32)          # h-1 exists
    m2 = (p_in < HW - W).astype(f32)      # h+1 exists
    sel = (p[None, :] // HW == jnp.arange(N, dtype=jnp.int32)[:, None]).astype(f32)
    aux = jnp.concatenate([m0[None, :], m2[None, :], sel], axis=0)     # (2+N, L)

    io_bytes = 4 * (x_cl.size + wconv.size + wfc.size + pvec.size + aux.size + Cp * L)
    cost = pl.CostEstimate(
        flops=int(2 * 2 * Cp * (3 * Cp) * L          # two fused conv dots
                  + 2 * 2 * Cp * Cp * N              # fc1 / fc2
                  + 2 * 2 * Cp * N * L               # gap + threshold selector dots
                  + 12 * Cp * L),                    # elementwise passes
        transcendentals=int(Cp * N + 4 * Cp),        # sigmoid exp + BN rsqrt
        bytes_accessed=int(io_bytes))

    kernel = functools.partial(rsbu_cw_kernel, n=N, hw=HW, row_w=W)

    out = pl.pallas_call(
        kernel,
        out_shape=jax.ShapeDtypeStruct((Cp, L), f32),
        in_specs=[pl.BlockSpec(memory_space=pltpu.MemorySpace.VMEM)] * 5,
        out_specs=pl.BlockSpec(memory_space=pltpu.MemorySpace.VMEM),
        cost_estimate=cost,
        compiler_params=pltpu.CompilerParams(
            vmem_limit_bytes=int(max(2 * 1024 * 1024, 16 * io_bytes))),
    )(x_cl, wconv, wfc, pvec, aux)

    out = out[:C].reshape(C, N, H, W)
    return jnp.transpose(out, (1, 0, 2, 3))


# --------------------------- pure-JAX reference ------------------------------

def reference_forward(x_nchw, params):
    w1, w2, g1, b1, g2, b2, fc1w, fc1b, g3, b3, fc2w, fc2b = params
    x = x_nchw.astype(jnp.float32)

    def bn_relu2d(v, g, b):
        mu = jnp.mean(v, axis=(0, 2, 3), keepdims=True)
        var = jnp.mean((v - mu) ** 2, axis=(0, 2, 3), keepdims=True)
        vn = (v - mu) / jnp.sqrt(var + EPS)
        return jnp.maximum(vn * g[None, :, None, None] + b[None, :, None, None], 0.0)

    def conv(v, w):   # w canonical (3, Cin, Cout) -> OIHW (Cout, Cin, 3, 1)
        ker = jnp.transpose(w, (2, 1, 0))[..., None]
        return lax.conv_general_dilated(
            v, ker, window_strides=(1, 1), padding=((1, 1), (0, 0)),
            dimension_numbers=("NCHW", "OIHW", "NCHW"))

    h = conv(bn_relu2d(x, g1, b1), w1)
    y = conv(bn_relu2d(h, g2, b2), w2)
    a = jnp.abs(y)
    gap = jnp.mean(a, axis=(2, 3))                                  # (N, C)
    s = gap @ fc1w.T + fc1b
    mu = jnp.mean(s, axis=0, keepdims=True)
    var = jnp.mean((s - mu) ** 2, axis=0, keepdims=True)
    s = jnp.maximum((s - mu) / jnp.sqrt(var + EPS) * g3 + b3, 0.0)
    z = jax.nn.sigmoid(s @ fc2w.T + fc2b)
    thres = (gap * z)[:, :, None, None]
    return jnp.sign(y) * jnp.maximum(a - thres, 0.0) + x


# --------------------------------- main --------------------------------------

if __name__ == "__main__":
    N, C, H, W = 2, 4, 16, 16                    # in_channel == out_channel (mode=0)
    key = jax.random.PRNGKey(0)
    ks = jax.random.split(key, 13)

    # conv weights stored canonically as (3 taps, C_in, C_out) == torch (Cout,Cin,3,1) rearranged
    w1 = 0.3 * jax.random.normal(ks[0], (3, C, C), jnp.float32)
    w2 = 0.3 * jax.random.normal(ks[1], (3, C, C), jnp.float32)
    g1 = 1.0 + 0.1 * jax.random.normal(ks[2], (C,), jnp.float32)
    b1 = 0.1 * jax.random.normal(ks[3], (C,), jnp.float32)
    g2 = 1.0 + 0.1 * jax.random.normal(ks[4], (C,), jnp.float32)
    b2 = 0.1 * jax.random.normal(ks[5], (C,), jnp.float32)
    fc1w = 0.3 * jax.random.normal(ks[6], (C, C), jnp.float32)     # torch (out, in) layout
    fc1b = 0.1 * jax.random.normal(ks[7], (C,), jnp.float32)
    g3 = 1.0 + 0.1 * jax.random.normal(ks[8], (C,), jnp.float32)
    b3 = 0.1 * jax.random.normal(ks[9], (C,), jnp.float32)
    fc2w = 0.3 * jax.random.normal(ks[10], (C, C), jnp.float32)    # torch (out, in) layout
    fc2b = 0.1 * jax.random.normal(ks[11], (C,), jnp.float32)
    params = (w1, w2, g1, b1, g2, b2, fc1w, fc1b, g3, b3, fc2w, fc2b)

    x = jax.random.normal(ks[12], (N, C, H, W), jnp.float32)

    out = rsbu_cw_forward(x, params)
    jax.block_until_ready(out)

    ref = reference_forward(x, params)
    np.testing.assert_allclose(np.asarray(out), np.asarray(ref), rtol=1e-3, atol=1e-3)

    print("KERNEL_OK")
</pallas_src>

<mosaic_0001>
module attributes {stable_mosaic.version = 11 : i64} {
  func.func @rsbu_cw_kernel(%arg0: memref<8x512xf32, #tpu.memory_space<vmem>>, %arg1: memref<2x8x24xf32, #tpu.memory_space<vmem>>, %arg2: memref<2x8x8xf32, #tpu.memory_space<vmem>>, %arg3: memref<8x8xf32, #tpu.memory_space<vmem>>, %arg4: memref<4x512xf32, #tpu.memory_space<vmem>>, %arg5: memref<8x512xf32, #tpu.memory_space<vmem>>) attributes {dimension_semantics = [], scalar_prefetch = 0 : i64, scratch_operands = 0 : i64, tpu.core_type = #tpu.core_type<tc>} {
    %c0 = arith.constant 0 : index
    %c0_0 = arith.constant 0 : index
    %0 = vector.load %arg0[%c0, %c0_0] : memref<8x512xf32, #tpu.memory_space<vmem>>, vector<8x512xf32>
    %c0_1 = arith.constant 0 : index
    %c0_2 = arith.constant 0 : index
    %1 = vector.load %arg3[%c0_1, %c0_2] : memref<8x8xf32, #tpu.memory_space<vmem>>, vector<8x8xf32>
    %2 = vector.extract_strided_slice %1 {offsets = [0, 0], sizes = [8, 1], strides = [1, 1]} : vector<8x8xf32> to vector<8x1xf32>
    %3 = vector.extract_strided_slice %1 {offsets = [0, 1], sizes = [8, 1], strides = [1, 1]} : vector<8x8xf32> to vector<8x1xf32>
    %4 = vector.extract_strided_slice %1 {offsets = [0, 2], sizes = [8, 1], strides = [1, 1]} : vector<8x8xf32> to vector<8x1xf32>
    %5 = vector.extract_strided_slice %1 {offsets = [0, 3], sizes = [8, 1], strides = [1, 1]} : vector<8x8xf32> to vector<8x1xf32>
    %6 = vector.extract_strided_slice %1 {offsets = [0, 4], sizes = [8, 1], strides = [1, 1]} : vector<8x8xf32> to vector<8x1xf32>
    %7 = vector.extract_strided_slice %1 {offsets = [0, 5], sizes = [8, 1], strides = [1, 1]} : vector<8x8xf32> to vector<8x1xf32>
    %8 = vector.extract_strided_slice %1 {offsets = [0, 6], sizes = [8, 1], strides = [1, 1]} : vector<8x8xf32> to vector<8x1xf32>
    %9 = vector.extract_strided_slice %1 {offsets = [0, 7], sizes = [8, 1], strides = [1, 1]} : vector<8x8xf32> to vector<8x1xf32>
    %c0_3 = arith.constant 0 : index
    %c0_4 = arith.constant 0 : index
    %c0_5 = arith.constant 0 : index
    %10 = vector.load %arg1[%c0_3, %c0_4, %c0_5] : memref<2x8x24xf32, #tpu.memory_space<vmem>>, vector<1x8x24xf32>
    %11 = vector.shape_cast %10 : vector<1x8x24xf32> to vector<8x24xf32>
    %c1 = arith.constant 1 : index
    %c0_6 = arith.constant 0 : index
    %c0_7 = arith.constant 0 : index
    %12 = vector.load %arg1[%c1, %c0_6, %c0_7] : memref<2x8x24xf32, #tpu.memory_space<vmem>>, vector<1x8x24xf32>
    %13 = vector.shape_cast %12 : vector<1x8x24xf32> to vector<8x24xf32>
    %c0_8 = arith.constant 0 : index
    %c0_9 = arith.constant 0 : index
    %c0_10 = arith.constant 0 : index
    %14 = vector.load %arg2[%c0_8, %c0_9, %c0_10] : memref<2x8x8xf32, #tpu.memory_space<vmem>>, vector<1x8x8xf32>
    %15 = vector.shape_cast %14 : vector<1x8x8xf32> to vector<8x8xf32>
    %c1_11 = arith.constant 1 : index
    %c0_12 = arith.constant 0 : index
    %c0_13 = arith.constant 0 : index
    %16 = vector.load %arg2[%c1_11, %c0_12, %c0_13] : memref<2x8x8xf32, #tpu.memory_space<vmem>>, vector<1x8x8xf32>
    %17 = vector.shape_cast %16 : vector<1x8x8xf32> to vector<8x8xf32>
    %c0_14 = arith.constant 0 : index
    %c0_15 = arith.constant 0 : index
    %18 = vector.load %arg4[%c0_14, %c0_15] : memref<4x512xf32, #tpu.memory_space<vmem>>, vector<4x512xf32>
    %19 = vector.extract_strided_slice %18 {offsets = [0, 0], sizes = [1, 512], strides = [1, 1]} : vector<4x512xf32> to vector<1x512xf32>
    %20 = vector.extract_strided_slice %18 {offsets = [1, 0], sizes = [1, 512], strides = [1, 1]} : vector<4x512xf32> to vector<1x512xf32>
    %21 = vector.extract_strided_slice %18 {offsets = [2, 0], sizes = [2, 512], strides = [1, 1]} : vector<4x512xf32> to vector<2x512xf32>
    %cst = arith.constant dense<0.000000e+00> : vector<8xf32>
    %22 = vector.multi_reduction <add>, %0, %cst [1] : vector<8x512xf32> to vector<8xf32>
    %23 = vector.shape_cast %22 : vector<8xf32> to vector<8x1xf32>
    %24 = arith.mulf %0, %0 : vector<8x512xf32>
    %cst_16 = arith.constant dense<0.000000e+00> : vector<8xf32>
    %25 = vector.multi_reduction <add>, %24, %cst_16 [1] : vector<8x512xf32> to vector<8xf32>
    %26 = vector.shape_cast %25 : vector<8xf32> to vector<8x1xf32>
    %cst_17 = arith.constant 0.001953125 : f32
    %27 = vector.broadcast %cst_17 : f32 to vector<8x1xf32>
    %28 = arith.mulf %23, %27 : vector<8x1xf32>
    %cst_18 = arith.constant 0.001953125 : f32
    %29 = vector.broadcast %cst_18 : f32 to vector<8x1xf32>
    %30 = arith.mulf %26, %29 : vector<8x1xf32>
    %31 = arith.mulf %28, %28 : vector<8x1xf32>
    %32 = arith.subf %30, %31 : vector<8x1xf32>
    %cst_19 = arith.constant 0.000000e+00 : f32
    %33 = vector.broadcast %cst_19 : f32 to vector<8x1xf32>
    %34 = arith.maximumf %32, %33 : vector<8x1xf32>
    %cst_20 = arith.constant 9.99999974E-6 : f32
    %35 = vector.broadcast %cst_20 : f32 to vector<8x1xf32>
    %36 = arith.addf %34, %35 : vector<8x1xf32>
    %37 = math.rsqrt %36 : vector<8x1xf32>
    %38 = arith.mulf %2, %37 : vector<8x1xf32>
    %39 = arith.mulf %28, %38 : vector<8x1xf32>
    %40 = arith.subf %3, %39 : vector<8x1xf32>
    %41 = vector.broadcast %38 : vector<8x1xf32> to vector<8x512xf32>
    %42 = arith.mulf %0, %41 : vector<8x512xf32>
    %43 = vector.broadcast %40 : vector<8x1xf32> to vector<8x512xf32>
    %44 = arith.addf %42, %43 : vector<8x512xf32>
    %cst_21 = arith.constant 0.000000e+00 : f32
    %45 = vector.broadcast %cst_21 : f32 to vector<8x512xf32>
    %46 = arith.maximumf %44, %45 : vector<8x512xf32>
    %c16_i32 = arith.constant 16 : i32
    %47 = tpu.dynamic_rotate %46 by %c16_i32 dim 1 : vector<8x512xf32>, i32 -> vector<8x512xf32>
    %48 = vector.broadcast %19 : vector<1x512xf32> to vector<8x512xf32>
    %49 = arith.mulf %47, %48 : vector<8x512xf32>
    %c496_i32 = arith.constant 496 : i32
    %50 = tpu.dynamic_rotate %46 by %c496_i32 dim 1 : vector<8x512xf32>, i32 -> vector<8x512xf32>
    %51 = vector.broadcast %20 : vector<1x512xf32> to vector<8x512xf32>
    %52 = arith.mulf %50, %51 : vector<8x512xf32>
    %53 = tpu.concatenate %49, %46, %52 in 0 : vector<8x512xf32>, vector<8x512xf32>, vector<8x512xf32> -> vector<24x512xf32>
    %cst_22 = arith.constant dense<0.000000e+00> : vector<8x512xf32>
    %54 = tpu.matmul %11, %53, %cst_22 {dimension_numbers = #tpu.dot_dimension_numbers<[1], [0], [0], [1], [0, 0, 1, 1], [], []>} : vector<8x24xf32>, vector<24x512xf32>, vector<8x512xf32> -> vector<8x512xf32>
    %cst_23 = arith.constant dense<0.000000e+00> : vector<8xf32>
    %55 = vector.multi_reduction <add>, %54, %cst_23 [1] : vector<8x512xf32> to vector<8xf32>
    %56 = vector.shape_cast %55 : vector<8xf32> to vector<8x1xf32>
    %57 = arith.mulf %54, %54 : vector<8x512xf32>
    %cst_24 = arith.constant dense<0.000000e+00> : vector<8xf32>
    %58 = vector.multi_reduction <add>, %57, %cst_24 [1] : vector<8x512xf32> to vector<8xf32>
    %59 = vector.shape_cast %58 : vector<8xf32> to vector<8x1xf32>
    %cst_25 = arith.constant 0.001953125 : f32
    %60 = vector.broadcast %cst_25 : f32 to vector<8x1xf32>
    %61 = arith.mulf %56, %60 : vector<8x1xf32>
    %cst_26 = arith.constant 0.001953125 : f32
    %62 = vector.broadcast %cst_26 : f32 to vector<8x1xf32>
    %63 = arith.mulf %59, %62 : vector<8x1xf32>
    %64 = arith.mulf %61, %61 : vector<8x1xf32>
    %65 = arith.subf %63, %64 : vector<8x1xf32>
    %cst_27 = arith.constant 0.000000e+00 : f32
    %66 = vector.broadcast %cst_27 : f32 to vector<8x1xf32>
    %67 = arith.maximumf %65, %66 : vector<8x1xf32>
    %cst_28 = arith.constant 9.99999974E-6 : f32
    %68 = vector.broadcast %cst_28 : f32 to vector<8x1xf32>
    %69 = arith.addf %67, %68 : vector<8x1xf32>
    %70 = math.rsqrt %69 : vector<8x1xf32>
    %71 = arith.mulf %4, %70 : vector<8x1xf32>
    %72 = arith.mulf %61, %71 : vector<8x1xf32>
    %73 = arith.subf %5, %72 : vector<8x1xf32>
    %74 = vector.broadcast %71 : vector<8x1xf32> to vector<8x512xf32>
    %75 = arith.mulf %54, %74 : vector<8x512xf32>
    %76 = vector.broadcast %73 : vector<8x1xf32> to vector<8x512xf32>
    %77 = arith.addf %75, %76 : vector<8x512xf32>
    %cst_29 = arith.constant 0.000000e+00 : f32
    %78 = vector.broadcast %cst_29 : f32 to vector<8x512xf32>
    %79 = arith.maximumf %77, %78 : vector<8x512xf32>
    %c16_i32_30 = arith.constant 16 : i32
    %80 = tpu.dynamic_rotate %79 by %c16_i32_30 dim 1 : vector<8x512xf32>, i32 -> vector<8x512xf32>
    %81 = vector.broadcast %19 : vector<1x512xf32> to vector<8x512xf32>
    %82 = arith.mulf %80, %81 : vector<8x512xf32>
    %c496_i32_31 = arith.constant 496 : i32
    %83 = tpu.dynamic_rotate %79 by %c496_i32_31 dim 1 : vector<8x512xf32>, i32 -> vector<8x512xf32>
    %84 = vector.broadcast %20 : vector<1x512xf32> to vector<8x512xf32>
    %85 = arith.mulf %83, %84 : vector<8x512xf32>
    %86 = tpu.concatenate %82, %79, %85 in 0 : vector<8x512xf32>, vector<8x512xf32>, vector<8x512xf32> -> vector<24x512xf32>
    %cst_32 = arith.constant dense<0.000000e+00> : vector<8x512xf32>
    %87 = tpu.matmul %13, %86, %cst_32 {dimension_numbers = #tpu.dot_dimension_numbers<[1], [0], [0], [1], [0, 0, 1, 1], [], []>} : vector<8x24xf32>, vector<24x512xf32>, vector<8x512xf32> -> vector<8x512xf32>
    %88 = math.absf %87 : vector<8x512xf32>
    %cst_33 = arith.constant dense<0.000000e+00> : vector<8x2xf32>
    %89 = tpu.matmul %88, %21, %cst_33 {dimension_numbers = #tpu.dot_dimension_numbers<[1], [1], [0], [0], [0, 0, 1, 0], [], []>} : vector<8x512xf32>, vector<2x512xf32>, vector<8x2xf32> -> vector<8x2xf32>
    %cst_34 = arith.constant 3.906250e-03 : f32
    %90 = vector.broadcast %cst_34 : f32 to vector<8x2xf32>
    %91 = arith.mulf %89, %90 : vector<8x2xf32>
    %cst_35 = arith.constant dense<0.000000e+00> : vector<8x2xf32>
    %92 = tpu.matmul %15, %91, %cst_35 {dimension_numbers = #tpu.dot_dimension_numbers<[1], [0], [0], [1], [0, 0, 1, 1], [], []>} : vector<8x8xf32>, vector<8x2xf32>, vector<8x2xf32> -> vector<8x2xf32>
    %93 = vector.broadcast %6 : vector<8x1xf32> to vector<8x2xf32>
    %94 = arith.addf %92, %93 : vector<8x2xf32>
    %cst_36 = arith.constant dense<0.000000e+00> : vector<8xf32>
    %95 = vector.multi_reduction <add>, %94, %cst_36 [1] : vector<8x2xf32> to vector<8xf32>
    %96 = vector.shape_cast %95 : vector<8xf32> to vector<8x1xf32>
    %97 = arith.mulf %94, %94 : vector<8x2xf32>
    %cst_37 = arith.constant dense<0.000000e+00> : vector<8xf32>
    %98 = vector.multi_reduction <add>, %97, %cst_37 [1] : vector<8x2xf32> to vector<8xf32>
    %99 = vector.shape_cast %98 : vector<8xf32> to vector<8x1xf32>
    %cst_38 = arith.constant 5.000000e-01 : f32
    %100 = vector.broadcast %cst_38 : f32 to vector<8x1xf32>
    %101 = arith.mulf %96, %100 : vector<8x1xf32>
    %cst_39 = arith.constant 5.000000e-01 : f32
    %102 = vector.broadcast %cst_39 : f32 to vector<8x1xf32>
    %103 = arith.mulf %99, %102 : vector<8x1xf32>
    %104 = arith.mulf %101, %101 : vector<8x1xf32>
    %105 = arith.subf %103, %104 : vector<8x1xf32>
    %cst_40 = arith.constant 0.000000e+00 : f32
    %106 = vector.broadcast %cst_40 : f32 to vector<8x1xf32>
    %107 = arith.maximumf %105, %106 : vector<8x1xf32>
    %cst_41 = arith.constant 9.99999974E-6 : f32
    %108 = vector.broadcast %cst_41 : f32 to vector<8x1xf32>
    %109 = arith.addf %107, %108 : vector<8x1xf32>
    %110 = math.rsqrt %109 : vector<8x1xf32>
    %111 = arith.mulf %7, %110 : vector<8x1xf32>
    %112 = arith.mulf %101, %111 : vector<8x1xf32>
    %113 = arith.subf %8, %112 : vector<8x1xf32>
    %114 = vector.broadcast %111 : vector<8x1xf32> to vector<8x2xf32>
    %115 = arith.mulf %94, %114 : vector<8x2xf32>
    %116 = vector.broadcast %113 : vector<8x1xf32> to vector<8x2xf32>
    %117 = arith.addf %115, %116 : vector<8x2xf32>
    %cst_42 = arith.constant 0.000000e+00 : f32
    %118 = vector.broadcast %cst_42 : f32 to vector<8x2xf32>
    %119 = arith.maximumf %117, %118 : vector<8x2xf32>
    %cst_43 = arith.constant dense<0.000000e+00> : vector<8x2xf32>
    %120 = tpu.matmul %17, %119, %cst_43 {dimension_numbers = #tpu.dot_dimension_numbers<[1], [0], [0], [1], [0, 0, 1, 1], [], []>} : vector<8x8xf32>, vector<8x2xf32>, vector<8x2xf32> -> vector<8x2xf32>
    %121 = vector.broadcast %9 : vector<8x1xf32> to vector<8x2xf32>
    %122 = arith.addf %120, %121 : vector<8x2xf32>
    %cst_44 = arith.constant 0.000000e+00 : f32
    %123 = vector.broadcast %cst_44 : f32 to vector<8x2xf32>
    %124 = arith.subf %123, %122 : vector<8x2xf32>
    %125 = math.exp %124 : vector<8x2xf32>
    %cst_45 = arith.constant 1.000000e+00 : f32
    %126 = vector.broadcast %cst_45 : f32 to vector<8x2xf32>
    %127 = arith.addf %126, %125 : vector<8x2xf32>
    %cst_46 = arith.constant 1.000000e+00 : f32
    %128 = vector.broadcast %cst_46 : f32 to vector<8x2xf32>
    %129 = arith.divf %128, %127 : vector<8x2xf32>
    %130 = arith.mulf %91, %129 : vector<8x2xf32>
    %cst_47 = arith.constant dense<0.000000e+00> : vector<8x512xf32>
    %131 = tpu.matmul %130, %21, %cst_47 {dimension_numbers = #tpu.dot_dimension_numbers<[1], [0], [0], [1], [0, 0, 1, 1], [], []>} : vector<8x2xf32>, vector<2x512xf32>, vector<8x512xf32> -> vector<8x512xf32>
    %cst_48 = arith.constant 0.000000e+00 : f32
    %132 = vector.broadcast %cst_48 : f32 to vector<8x512xf32>
    %133 = arith.subf %132, %131 : vector<8x512xf32>
    %134 = arith.maximumf %87, %133 : vector<8x512xf32>
    %135 = arith.minimumf %134, %131 : vector<8x512xf32>
    %136 = arith.subf %87, %135 : vector<8x512xf32>
    %137 = arith.addf %136, %0 : vector<8x512xf32>
    %c0_49 = arith.constant 0 : index
    %c0_50 = arith.constant 0 : index
    %138 = vector.load %arg5[%c0_49, %c0_50] : memref<8x512xf32, #tpu.memory_space<vmem>>, vector<8x512xf32>
    tpu.vector_store %arg5[%c0_49, %c0_50], %137 {strides = array<i32>} : memref<8x512xf32, #tpu.memory_space<vmem>>, vector<8x512xf32>,
    return
  }
}

</mosaic_0001>

<bundles_post_ra>
// kernel: tpu_custom_call.1
= control target key start
LH: loop header
LB: loop body
LE: loop exit
PB: predicated region body
PF: predicated region fallthrough
CT: control target
= control target key end

     0   :  { %10 = vsyncpa [#allocation3], 0  ;;  %s1307_s0 = inlined_call_operand.hbm [shape: f32[8,512], index: 0, kind: input, shape index: {}]   ;;  %s1308_s1 = inlined_call_operand.hbm [shape: f32[2,8,24], index: 1, kind: input, shape index: {}]   ;;  %s1309_s2 = inlined_call_operand.hbm [shape: f32[2,8,8], index: 2, kind: input, shape index: {}]   ;;  %s1310_s3 = inlined_call_operand.hbm [shape: f32[8,8], index: 3, kind: input, shape index: {}]   ;;  %s1311_s4 = inlined_call_operand.hbm [shape: f32[4,512], index: 4, kind: input, shape index: {}]   ;;  %s1312_s5 = inlined_call_operand.hbm [shape: f32[8,512], index: 5, kind: output, shape index: {}]  }
   0x1   :  { %11 = vsyncpa [#allocation6], 0 }
   0x2   :  { %12 = vsyncpa [#allocation9], 0  ;;  %s29_s20 = sshll.u32 %s1308_s1, 4  ;;  %s30_s20 = int_to_ptr.hbm [resolvable:$true] %s29_s20 }
   0x3   :  { %13 = vsyncpa [#allocation4], 0  ;;  %s1059_s21 = smov [#allocation5]   ;;  %s56_s25 = sshll.u32 %s1310_s3, 4  ;;  %s57_s25 = int_to_ptr.hbm [resolvable:$true] %s56_s25 }
   0x4   :  { %s31_s22 = sshll.u32 %s1059_s21, 4  ;;  %s1060_s26 = smov 128   ;;  %s32_s22 = int_to_ptr.vmem [resolvable:$true] %s31_s22 }
   0x5   :  { %s1061_s27 = smov 8   ;;  %s1062_s28 = smov [#allocation8]  }
   0x6   :  { %37 = dma.hbm_to_vmem [thread:$0]  %s30_s20, 256, %s32_s22, [#allocation6], %s1060_s26, %s1060_s26, %s1061_s27  }
   0x7   :  { %s58_s29 = sshll.u32 %s1062_s28, 4  ;;  %s19_s7 = sshll.u32 %s1307_s0, 4  ;;  %s59_s29 = int_to_ptr.vmem [resolvable:$true] %s58_s29  ;;  %s20_s7 = int_to_ptr.hbm [resolvable:$true] %s19_s7 }
   0x8   :  { %61 = dma.hbm_to_vmem [thread:$0]  %s57_s25, 128, %s59_s29, [#allocation9]  }
   0x9   :  { %s42_s9 = sshll.u32 %s1309_s2, 4  ;;  %s1063_s10 = smov [#allocation2]   ;;  %s43_s9 = int_to_ptr.hbm [resolvable:$true] %s42_s9 }
   0xa   :  { %s21_s11 = sshll.u32 %s1063_s10, 4  ;;  %s1064_s3 = smov [#allocation7]   ;;  %s22_s11 = int_to_ptr.vmem [resolvable:$true] %s21_s11 }
   0xb   :  { %24 = dma.hbm_to_vmem [thread:$0]  %s20_s7, 512, %s22_s11, [#allocation3]  }
   0xc   :  { %s44_s12 = sshll.u32 %s1064_s3, 4  ;;  %s67_s15 = sshll.u32 %s1311_s4, 4  ;;  %s45_s12 = int_to_ptr.vmem [resolvable:$true] %s44_s12  ;;  %s68_s15 = int_to_ptr.hbm [resolvable:$true] %s67_s15 }
   0xd   :  { %50 = dma.hbm_to_vmem [thread:$0]  %s43_s9, 256, %s45_s12, [#allocation6], %s1060_s26, %s1060_s26, %s1061_s27  }
   0xe   :  { %s1065_s0 = smov [#allocation10]  }
   0xf   :  { %s69_s16 = sshll.u32 %s1065_s0, 4  ;;  %s70_s16 = int_to_ptr.vmem [resolvable:$true] %s69_s16 }
  0x10   :  { %72 = dma.hbm_to_vmem [thread:$0]  %s68_s15, 256, %s70_s16, [#allocation9]  }
  0x11   :  { %1051 = dma.done.wait [#allocation3], 512  }
  0x12   :  { %1052 = vsyncadd [#allocation3], 4294966784 }
  0x13   :  { %1053 = dma.done.wait [#allocation6], 512  }
  0x14   :  { %1054 = vsyncadd [#allocation6], 4294966784 }
  0x15   :  { %1055 = dma.done.wait [#allocation9], 384  }
  0x16   :  { %1056 = vsyncadd [#allocation9], 4294966912  ;;  %v1123_v0 = vld [vmem:[#allocation2] sm:$0xff]  ;;  %v1125_v1 = vld [vmem:[#allocation2 + $0x8] sm:$0xff]  ;;  %v1066_v17 = vmov 0   ;;  %s1067_s2 = smov 1   ;;  %v173_v53 = vlaneseq }
  0x17   :  { %v1127_v2 = vld [vmem:[#allocation2 + $0x10] sm:$0xff]  ;;  %v106_v3 = vadd.f32 %v1125_v1, %v1123_v0  ;;  %v111_v4 = vmul.f32 %v1123_v0, %v1123_v0  ;;  %v112_v5 = vmul.f32 %v1125_v1, %v1125_v1  ;;  %v1135_v6 = vld [vmem:[#allocation2 + $0x18] sm:$0xff]  ;;  %888 = vset.pattern.permute.xlu1 %v1066_v17  ;;  %v1143_v28 = vld [vmem:[#allocation8] sm:$0xff]  ;;  %v1068_v33 = vmov 1   ;;  %s1069_s4 = smov 112   ;;  %s1070_s17 = smov 16  }
  0x18   :  { %v113_v8 = vmul.f32 %v1127_v2, %v1127_v2  ;;  %v114_v11 = vmul.f32 %v1135_v6, %v1135_v6  ;;  %889 = vset.pattern.permute.xlu2 %v1068_v33  ;;  %v1160_v50 = vld [vmem:[#allocation10] sm:$0xff]  ;;  %v1163_v51 = vld [vmem:[#allocation10 + $0x8] sm:$0xff]  ;;  %v1166_v55 = vand.u32 127, %v173_v53  ;;  %vm227_vm5 = vcmask 195584   ;;  %s1077_s18 = smov [#allocation11]   ;;  %s839_s22 = sshll.u32 %s1312_s5, 4  ;;  %s840_s22 = int_to_ptr.hbm [resolvable:$true] %s839_s22 }
  0x19   :  { %v107_v7 = vadd.f32 %v106_v3, %v1127_v2  ;;  %v115_v9 = vadd.f32 %v112_v5, %v111_v4  ;;  %489 = vst [vmem:[#allocation1] ss:$2 sm:$0xff] %v1160_v50  ;;  %v212_v56 = vperm.slane %v1160_v50, 5  ;;  %v183_v61 = vperm.slane %v1160_v50, 4  ;;  %s837_s19 = sshll.u32 %s1077_s18, 4  ;;  %s838_s19 = int_to_ptr.vmem [resolvable:$true] %s837_s19 }
  0x1a   :  { %491 = vst [vmem:[#allocation1 + $0x10] ss:$2 sm:$0xff] %v1163_v51  ;;  %vm206_vm3 = vcmp.lt.s32.totalorder %v1166_v55, 112  ;;  %v213_v62 = vperm.slane %v1163_v51, 1  ;;  %v211_v63 = vperm.slane %v1160_v50, 1  ;;  %v214_v3 = vperm.slane %v1163_v51, 5 }
  0x1b   :  { %v108_v10 = vadd.f32 %v107_v7, %v1135_v6  ;;  %v116_v12 = vadd.f32 %v115_v9, %v113_v8  ;;  %v1170_v57 = vperm.slane %v212_v56, 1  ;;  %vm175_vm4 = vcmp.lt.s32.totalorder %v1166_v55, 16 }
  0x1c   :  { %v1180_v4 = vperm.slane %v183_v61, 0  ;;  %v1182_v5 = vperm.slane %v213_v62, 1  ;;  %v1184_v7 = vperm.slane %v211_v63, 1  ;;  %v1186_v8 = vperm.slane %v214_v3, 1 }
  0x1d   :  { %109 = vadd.xlane.f32.xlu0 %v108_v10  ;;  %v117_v13 = vadd.f32 %v116_v12, %v114_v11  ;;  %v1071_v56 = vmov 2   ;;  %vm590_vm9 = vcmask 64512   ;;  %vm614_vm10 = vcmask 15360  }
  0x1e   :  { %vm719_vm14 = vcmask 1041408  }
  0x25   :  { %118 = vadd.xlane.f32.xlu0 %v117_v13 }
  0x90   :  { %v110_v14 = vpop.xlane.xlu0 %109 }
  0x91   :  { %v120_v15 = vmul.f32 0.001953125, %v110_v14 }
  0x93   :  { %v122_v18 = vmul.f32 %v120_v15, %v120_v15 }
  0x98   :  { %v119_v16 = vpop.xlane.xlu0 %118 }
  0x99   :  { %v121_v19 = vmul.f32 0.001953125, %v119_v16 }
  0x9b   :  { %v123_v20 = vsub.f32 %v121_v19, %v122_v18 }
  0x9d   :  { %v124_v21 = vmax.f32 %v123_v20, 0.0  ;;  %v184_v20 = vperm.slane %v1163_v51, 0 }
  0x9f   :  { %v125_v22 = vadd.f32 1e-05, %v124_v21  ;;  %v98_v21 = vld [vmem:[#allocation5] sm:$0xff] }
  0xa1   :  { %897 = vrsqrt.f32 %v125_v22  ;;  %vm132_vm1 = vweird.f32 %v125_v22 }
  0xa7   :  { %v898_v23 = vpop.eup %897 }
  0xa8   :  { %v127_v24 = vmul.f32 %v898_v23, %v125_v22  ;;  %vm133_vm0 = vweird.f32 %v898_v23  ;;  %v1202_v22 = vperm.slane %v184_v20, 0 }
  0xa9   :  { %vm134_vm2 = vmor %vm132_vm1, %vm133_vm0 }
  0xaa   :  { %v128_v25 = vmul.f32 %v898_v23, %v127_v24 }
  0xac   :  { %v129_v26 = vmul.f32 0.5, %v128_v25 }
  0xae   :  { %v130_v27 = vsub.f32 1.5, %v129_v26  ;;  %v182_v26 = vperm.slane %v1160_v50, 0 }
  0xb0   :  { %v131_v29 = vmul.f32 %v898_v23, %v130_v27  ;;  %v185_v27 = vperm.slane %v1163_v51, 4 }
  0xb2   :  { %v135_v30 = vsel %vm134_vm2, %v898_v23, %v131_v29  ;;  %v1210_v29 = vperm.slane %v182_v26, 0 }
  0xb3   :  { %v136_v31 = vmul.f32 %v135_v30, %v1143_v28  ;;  %v1212_v30 = vperm.slane %v185_v27, 0 }
  0xb5   :  { %v137_v32 = vmul.f32 %v136_v31, %v120_v15 }
  0xb7   :  { %139 = vrot.lane.b32.xlu1 %v137_v32, %s1067_s2 }
  0xbf   :  { %145 = vperm.xlu1 %888, %v136_v31  }
 0x129   :  { %v140_v34 = vpop.permute.xlu1 %139 }
 0x12a   :  { %v142_v35 = vsub.f32 %v1143_v28, %v140_v34 }
 0x12c   :  { %154 = vperm.xlu2 %889, %v142_v35  }
 0x131   :  { %v146_v36 = vpop.permute.xlu1 %145 }
 0x132   :  { %v148_v37 = vmul.f32 %v146_v36, %v1123_v0  ;;  %v150_v38 = vmul.f32 %v146_v36, %v1127_v2  ;;  %v151_v39 = vmul.f32 %v146_v36, %v1135_v6  ;;  %v149_v47 = vmul.f32 %v146_v36, %v1125_v1 }
 0x134   :  { %890 = vset.pattern.permute.xlu2 %v1071_v56 }
 0x186   :  { %v155_v40 = vpop.permute.xlu2 %154 }
 0x187   :  { %v160_v41 = vadd.f32 %v155_v40, %v151_v39  ;;  %v159_v42 = vadd.f32 %v155_v40, %v150_v38  ;;  %v157_v43 = vadd.f32 %v155_v40, %v148_v37  ;;  %v158_v48 = vadd.f32 %v155_v40, %v149_v47 }
 0x189   :  { %v164_v44 = vmax.f32 %v160_v41, 0.0  ;;  %v163_v45 = vmax.f32 %v159_v42, 0.0  ;;  %v161_v46 = vmax.f32 %v157_v43, 0.0  ;;  %v162_v49 = vmax.f32 %v158_v48, 0.0 }
 0x18b   :  { %204 = vrot.lane.b32.xlu0 %v164_v44, %s1069_s4  ;;  %202 = vrot.lane.b32.xlu2 %v163_v45, %s1069_s4 }
 0x18c   :  { %198 = vrot.lane.b32.xlu1 %v161_v46, %s1069_s4 }
 0x193   :  { %167 = vrot.lane.b32.xlu2 %v162_v49, %s1070_s17 }
 0x194   :  { %169 = vrot.lane.b32.xlu1 %v163_v45, %s1070_s17 }
 0x19b   :  { %200 = vrot.lane.b32.xlu2 %v162_v49, %s1069_s4 }
 0x19c   :  { %171 = vrot.lane.b32.xlu1 %v164_v44, %s1070_s17 }
 0x1a3   :  { %165 = vrot.lane.b32.xlu2 %v161_v46, %s1070_s17 }
 0x1e5   :  { %v203_v52 = vpop.permute.xlu2 %202 }
 0x1ed   :  { %v168_v54 = vpop.permute.xlu2 %167 }
 0x1f5   :  { %v201_v58 = vpop.permute.xlu2 %200 }
 0x1f6   :  { %v208_v59 = vsel %vm206_vm3, %v201_v58, %v203_v52 }
 0x1f7   :  { %v224_v60 = vmul.f32 %v1170_v57, %v208_v59 }
 0x1f9   :  { %264 = vmatpush.msra.mxu1 %v224_v60 }
 0x1fb   :  { %265 = vmatpush.msra.mxu1 %v162_v49 }
 0x1fd   :  { %v205_v9 = vpop.permute.xlu0 %204  ;;  %v166_v10 = vpop.permute.xlu2 %165 }
 0x1fe   :  { %v178_v11 = vsel %vm175_vm4, %v166_v10, %v168_v54  ;;  %v199_v12 = vpop.permute.xlu1 %198  ;;  %v207_v13 = vsel %vm206_vm3, %v203_v52, %v205_v9 }
 0x1ff   :  { %v209_v14 = vsel %vm206_vm3, %v199_v12, %v201_v58  ;;  %v195_v15 = vmul.f32 %v1180_v4, %v178_v11  ;;  %v225_v16 = vmul.f32 %v1182_v5, %v207_v13  ;;  %v210_v17 = vsel %vm206_vm3, %v205_v9, %v199_v12 }
 0x200   :  { %v223_v18 = vmul.f32 %v1184_v7, %v209_v14  ;;  %v226_v19 = vmul.f32 %v1186_v8, %v210_v17 }
 0x201   :  { %266 = vmatpush.msra.mxu1 %v195_v15  ;;  %284 = vmatpush.msra.mxu2 %v225_v16  ;;  %v1072_v16 = vmov 3  }
 0x202   :  { %244 = vmatpush.msra.mxu0 %v223_v18  ;;  %304 = vmatpush.msra.mxu3 %v226_v19 }
 0x203   :  { %285 = vmatpush.msra.mxu2 %v163_v45  ;;  %852 = vmatmul.msk.f32.vlgmr.msra.gmra.mxu1 %vm227_vm5, %v98_v21 }
 0x204   :  { %245 = vmatpush.msra.mxu0 %v161_v46  ;;  %305 = vmatpush.msra.mxu3 %v164_v44 }
 0x206   :  { %v170_v23 = vpop.permute.xlu1 %169 }
 0x207   :  { %v177_v24 = vsel %vm175_vm4, %v168_v54, %v170_v23 }
 0x208   :  { %v196_v25 = vmul.f32 %v1202_v22, %v177_v24 }
 0x20a   :  { %286 = vmatpush.msra.mxu2 %v196_v25 }
 0x20b   :  { %853 = vmatmul.msk.f32.vlgmr.msra.gmra.mxu2 %vm227_vm5, %v98_v21 }
 0x20e   :  { %v172_v31 = vpop.permute.xlu1 %171 }
 0x20f   :  { %v176_v32 = vsel %vm175_vm4, %v170_v23, %v172_v31  ;;  %v179_v33 = vsel %vm175_vm4, %v172_v31, %v166_v10 }
 0x210   :  { %v194_v34 = vmul.f32 %v1210_v29, %v179_v33  ;;  %v197_v35 = vmul.f32 %v1212_v30, %v176_v32 }
 0x212   :  { %246 = vmatpush.msra.mxu0 %v194_v34  ;;  %306 = vmatpush.msra.mxu3 %v197_v35 }
 0x213   :  { %854 = vmatmul.msk.f32.vlgmr.msra.gmra.mxu3 %vm227_vm5, %v98_v21  ;;  %851 = vmatmul.msk.f32.vlgmr.msra.gmra.mxu0 %vm227_vm5, %v98_v21 }
 0x280   :  { %v268_v36 = vpop.f32.mrf.mxu1 }
 0x281   :  { %v317_v38 = vmul.f32 %v268_v36, %v268_v36 }
 0x28e   :  { %v288_v37 = vpop.f32.mrf.mxu2 }
 0x28f   :  { %v318_v42 = vmul.f32 %v288_v37, %v288_v37 }
 0x290   :  { %v248_v39 = vpop.f32.mrf.mxu0 }
 0x291   :  { %v316_v40 = vmul.f32 %v248_v39, %v248_v39  ;;  %v311_v41 = vadd.f32 %v268_v36, %v248_v39 }
 0x293   :  { %v312_v43 = vadd.f32 %v311_v41, %v288_v37  ;;  %v320_v44 = vadd.f32 %v317_v38, %v316_v40 }
 0x295   :  { %v321_v45 = vadd.f32 %v320_v44, %v318_v42 }
 0x296   :  { %v308_v46 = vpop.f32.mrf.mxu3 }
 0x297   :  { %v313_v47 = vadd.f32 %v312_v43, %v308_v46  ;;  %v319_v48 = vmul.f32 %v308_v46, %v308_v46 }
 0x299   :  { %314 = vadd.xlane.f32.xlu0 %v313_v47  ;;  %v322_v49 = vadd.f32 %v321_v45, %v319_v48  ;;  %v100_v48 = vld [vmem:[#allocation5 + $0x8] sm:$0xff] }
 0x29b   :  { %323 = vadd.xlane.f32.xlu1 %v322_v49 }
 0x30c   :  { %v315_v52 = vpop.xlane.xlu0 %314 }
 0x30d   :  { %v325_v53 = vmul.f32 0.001953125, %v315_v52 }
 0x30e   :  { %v324_v54 = vpop.xlane.xlu1 %323 }
 0x30f   :  { %v327_v58 = vmul.f32 %v325_v53, %v325_v53  ;;  %v326_v59 = vmul.f32 0.001953125, %v324_v54 }
 0x311   :  { %v328_v60 = vsub.f32 %v326_v59, %v327_v58 }
 0x313   :  { %v329_v61 = vmax.f32 %v328_v60, 0.0 }
 0x315   :  { %v330_v62 = vadd.f32 1e-05, %v329_v61 }
 0x317   :  { %899 = vrsqrt.f32 %v330_v62  ;;  %vm337_vm7 = vweird.f32 %v330_v62 }
 0x31d   :  { %v900_v63 = vpop.eup %899 }
 0x31e   :  { %v332_v3 = vmul.f32 %v900_v63, %v330_v62  ;;  %vm338_vm6 = vweird.f32 %v900_v63  ;;  %v495_v62 = vld.sshfl [vmem:[#allocation1 + $0x18] sm:$0xff pattern:$0x75316420] }
 0x31f   :  { %vm339_vm8 = vmor %vm337_vm7, %vm338_vm6  ;;  %v499_v55 = vrot.slane %v495_v62, 2 }
 0x320   :  { %v333_v9 = vmul.f32 %v900_v63, %v332_v3  ;;  %v493_v3 = vld.sshfl [vmem:[#allocation1 + $0x8] sm:$0xff pattern:$0x75316420] }
 0x322   :  { %v334_v10 = vmul.f32 0.5, %v333_v9 }
 0x324   :  { %v335_v11 = vsub.f32 1.5, %v334_v10 }
 0x326   :  { %v336_v12 = vmul.f32 %v900_v63, %v335_v11 }
 0x328   :  { %v340_v13 = vsel %vm339_vm8, %v900_v63, %v336_v12  ;;  %v492_v63 = vld.sshfl [vmem:[#allocation1] sm:$0xff pattern:$0x75316420] }
 0x329   :  { %v341_v14 = vmul.f32 %v340_v13, %v1143_v28  ;;  %v496_v9 = vrot.slane %v492_v63, 2  ;;  %705 = vst [vmem:[#allocation1] ss:$2 sm:$0xff] %v1160_v50  ;;  %v1073_v50 = vmov 4  }
 0x32b   :  { %v342_v15 = vmul.f32 %v341_v14, %v325_v53 }
 0x32d   :  { %344 = vrot.lane.b32.xlu2 %v342_v15, %s1067_s2 }
 0x335   :  { %350 = vperm.xlu2 %890, %v341_v14  }
 0x33d   :  { %891 = vset.pattern.permute.xlu2 %v1072_v16 }
 0x387   :  { %v345_v17 = vpop.permute.xlu2 %344 }
 0x388   :  { %v347_v18 = vsub.f32 %v1143_v28, %v345_v17 }
 0x38a   :  { %359 = vperm.xlu2 %891, %v347_v18  }
 0x38f   :  { %v351_v19 = vpop.permute.xlu2 %350 }
 0x390   :  { %v353_v20 = vmul.f32 %v351_v19, %v248_v39  ;;  %v355_v21 = vmul.f32 %v351_v19, %v288_v37  ;;  %v356_v31 = vmul.f32 %v351_v19, %v308_v46  ;;  %v354_v34 = vmul.f32 %v351_v19, %v268_v36 }
 0x392   :  { %892 = vset.pattern.permute.xlu2 %v1073_v50 }
 0x3e4   :  { %v360_v23 = vpop.permute.xlu2 %359 }
 0x3e5   :  { %v364_v24 = vadd.f32 %v360_v23, %v355_v21  ;;  %v362_v25 = vadd.f32 %v360_v23, %v353_v20  ;;  %v365_v32 = vadd.f32 %v360_v23, %v356_v31  ;;  %v363_v35 = vadd.f32 %v360_v23, %v354_v34 }
 0x3e7   :  { %v368_v26 = vmax.f32 %v364_v24, 0.0  ;;  %v366_v27 = vmax.f32 %v362_v25, 0.0  ;;  %v369_v33 = vmax.f32 %v365_v32, 0.0  ;;  %v367_v37 = vmax.f32 %v363_v35, 0.0  ;;  %v101_v25 = vld [vmem:[#allocation7] sm:$0xff] }
 0x3e9   :  { %374 = vrot.lane.b32.xlu1 %v368_v26, %s1070_s17  ;;  %390 = vrot.lane.b32.xlu2 %v368_v26, %s1069_s4 }
 0x3ea   :  { %386 = vrot.lane.b32.xlu0 %v366_v27, %s1069_s4 }
 0x3f1   :  { %392 = vrot.lane.b32.xlu2 %v369_v33, %s1069_s4 }
 0x3f2   :  { %370 = vrot.lane.b32.xlu0 %v366_v27, %s1070_s17 }
 0x3f9   :  { %372 = vrot.lane.b32.xlu2 %v367_v37, %s1070_s17 }
 0x401   :  { %376 = vrot.lane.b32.xlu2 %v369_v33, %s1070_s17 }
 0x409   :  { %388 = vrot.lane.b32.xlu2 %v367_v37, %s1069_s4 }
 0x411   :  { %587 = vperm.xlu2 %892, %v1143_v28  }
 0x443   :  { %v391_v38 = vpop.permute.xlu2 %390 }
 0x44b   :  { %v393_v39 = vpop.permute.xlu2 %392 }
 0x44c   :  { %v394_v40 = vsel %vm206_vm3, %v391_v38, %v393_v39 }
 0x44d   :  { %v400_v41 = vmul.f32 %v394_v40, %v1182_v5 }
 0x44f   :  { %458 = vmatpush.msrb.mxu2 %v400_v41 }
 0x451   :  { %459 = vmatpush.msrb.mxu2 %v368_v26 }
 0x453   :  { %v373_v36 = vpop.permute.xlu2 %372 }
 0x45b   :  { %v375_v42 = vpop.permute.xlu1 %374  ;;  %v377_v43 = vpop.permute.xlu2 %376 }
 0x45c   :  { %v379_v44 = vsel %vm175_vm4, %v373_v36, %v375_v42  ;;  %v387_v45 = vpop.permute.xlu0 %386  ;;  %v378_v5 = vsel %vm175_vm4, %v375_v42, %v377_v43 }
 0x45d   :  { %v397_v46 = vsel %vm206_vm3, %v393_v39, %v387_v45  ;;  %v384_v47 = vmul.f32 %v379_v44, %v1202_v22  ;;  %v385_v52 = vmul.f32 %v378_v5, %v1212_v30  ;;  %v1074_v39 = vmov 5  }
 0x45e   :  { %v401_v49 = vmul.f32 %v397_v46, %v1186_v8  ;;  %893 = vset.pattern.permute.xlu2 %v1074_v39 }
 0x45f   :  { %460 = vmatpush.msrb.mxu2 %v384_v47 }
 0x460   :  { %478 = vmatpush.msrb.mxu3 %v401_v49  ;;  %857 = vmatmul.msk.f32.vlgmr.msrb.gmra.mxu2 %vm227_vm5, %v100_v48 }
 0x462   :  { %479 = vmatpush.msrb.mxu3 %v369_v33 }
 0x463   :  { %v389_v53 = vpop.permute.xlu2 %388 }
 0x464   :  { %v395_v54 = vsel %vm206_vm3, %v389_v53, %v391_v38  ;;  %v396_v22 = vsel %vm206_vm3, %v387_v45, %v389_v53  ;;  %480 = vmatpush.msrb.mxu3 %v385_v52  ;;  %v371_v56 = vpop.permute.xlu0 %370 }
 0x465   :  { %858 = vmatmul.msk.f32.vlgmr.msrb.gmra.mxu3 %vm227_vm5, %v100_v48  ;;  %v398_v8 = vmul.f32 %v396_v22, %v1184_v7  ;;  %v399_v58 = vmul.f32 %v395_v54, %v1170_v57  ;;  %v380_v59 = vsel %vm175_vm4, %v371_v56, %v373_v36  ;;  %v381_v30 = vsel %vm175_vm4, %v377_v43, %v371_v56  ;;  %v494_v57 = vld.sshfl [vmem:[#allocation1 + $0x10] sm:$0xff pattern:$0x75316420] }
 0x466   :  { %v382_v60 = vmul.f32 %v381_v30, %v1210_v29  ;;  %v383_v61 = vmul.f32 %v380_v59, %v1180_v4  ;;  %v498_v7 = vrot.slane %v494_v57, 2  ;;  %707 = vst [vmem:[#allocation1 + $0x10] ss:$2 sm:$0xff] %v1163_v51  ;;  %579 = vmatpush.xpose.msra.mxu3 %v499_v55  ;;  %v497_v29 = vrot.slane %v493_v3, 2  ;;  %v103_v57 = vld [vmem:[#allocation7 + $0x8] sm:$0xff] }
 0x467   :  { %418 = vmatpush.msrb.mxu0 %v398_v8  ;;  %438 = vmatpush.msrb.mxu1 %v399_v58  ;;  %v1075_v54 = vmov 6   ;;  %v1076_v8 = vmov 7   ;;  %v709_v55 = vld.sshfl [vmem:[#allocation1 + $0x8] sm:$0xff pattern:$0x75316420] }
 0x468   :  { %559 = vmatpush.xpose.msra.mxu2 %v498_v7  ;;  %896 = vset.pattern.permute.xlu0 %v1076_v8  ;;  %v708_v7 = vld.sshfl [vmem:[#allocation1] sm:$0xff pattern:$0x75316420]  ;;  %v713_v63 = vrot.slane %v709_v55, 2 }
 0x469   :  { %419 = vmatpush.msrb.mxu0 %v366_v27  ;;  %439 = vmatpush.msrb.mxu1 %v367_v37  ;;  %v712_v62 = vrot.slane %v708_v7, 2 }
 0x46a   :  { %863 = vmatpush.msk.msrb.mxu3 %vm719_vm14, %v713_v63 }
 0x46b   :  { %420 = vmatpush.msrb.mxu0 %v382_v60  ;;  %440 = vmatpush.msrb.mxu1 %v383_v61  ;;  %v588_v26 = vpop.permute.xlu2 %587 }
 0x46c   :  { %855 = vmatmul.msk.f32.vlgmr.msrb.gmra.mxu0 %vm227_vm5, %v100_v48  ;;  %856 = vmatmul.msk.f32.vlgmr.msrb.gmra.mxu1 %vm227_vm5, %v100_v48 }
 0x46d   :  { %519 = vmatpush.xpose.msra.mxu0 %v496_v9  ;;  %539 = vmatpush.xpose.msra.mxu1 %v497_v29  ;;  %v710_v3 = vld.sshfl [vmem:[#allocation1 + $0x10] sm:$0xff pattern:$0x75316420] }
 0x46e   :  { %861 = vmatpush.msk.msrb.mxu2 %vm719_vm14, %v712_v62  ;;  %v714_v29 = vrot.slane %v710_v3, 2 }
 0x4e3   :  { %v1263_v4 = vpop.f32.mrf.mxu2 }
 0x4e4   :  { %v487_v10 = vand.u32 2147483647, %v1263_v4 }
 0x4e6   :  { %560 = vmatmul.f32.vlgmr.msra.gmra.mxu2 %v487_v10  ;;  %v711_v10 = vld.sshfl [vmem:[#allocation1 + $0x18] sm:$0xff pattern:$0x75316420] }
 0x4e8   :  { %v1266_v11 = vpop.f32.mrf.mxu3 }
 0x4e9   :  { %v488_v12 = vand.u32 2147483647, %v1266_v11  ;;  %v1269_v13 = vpop.f32.mrf.mxu0  ;;  %v1271_v51 = vpop.f32.mrf.mxu1 }
 0x4ea   :  { %v485_v14 = vand.u32 2147483647, %v1269_v13  ;;  %v486_v15 = vand.u32 2147483647, %v1271_v51 }
 0x4eb   :  { %580 = vmatmul.f32.vlgmr.msra.gmra.mxu3 %v488_v12 }
 0x4ec   :  { %520 = vmatmul.f32.vlgmr.msra.gmra.mxu0 %v485_v14  ;;  %540 = vmatmul.f32.vlgmr.msra.gmra.mxu1 %v486_v15 }
 0x569   :  { %v521_v16 = vpop.f32.mrf.mxu0  ;;  %v541_v17 = vpop.f32.mrf.mxu1 }
 0x56a   :  { %v542_v18 = vadd.f32 %v541_v17, %v521_v16  ;;  %v561_v19 = vpop.f32.mrf.mxu2 }
 0x56c   :  { %v562_v20 = vadd.f32 %v561_v19, %v542_v18 }
 0x56e   :  { %v581_v21 = vpop.f32.mrf.mxu3 }
 0x56f   :  { %v582_v23 = vadd.f32 %v581_v21, %v562_v20 }
 0x571   :  { %v1276_v24 = vmul.f32 0.00390625, %v582_v23 }
 0x573   :  { %609 = vmatpush.msrb.mxu0 %v1276_v24 }
 0x574   :  { %859 = vmatmul.msk.f32.vlgmr.msrb.gmra.mxu0 %vm590_vm9, %v101_v25 }
 0x575   :  { %865 = vmatpush.msk.msra.mxu0 %vm719_vm14, %v714_v29 }
 0x5f1   :  { %v611_v27 = vpop.f32.mrf.mxu0 }
 0x5f2   :  { %v612_v31 = vadd.f32 %v611_v27, %v588_v26 }
 0x5f4   :  { %v615_v32 = vsel %vm614_vm10, %v612_v31, 0.0  ;;  %v618_v33 = vmul.f32 %v612_v31, %v612_v31 }
 0x5f5   :  { %616 = vadd.xlane.f32.xlu0 %v615_v32 }
 0x5f6   :  { %v619_v34 = vsel %vm614_vm10, %v618_v33, 0.0 }
 0x5f7   :  { %620 = vadd.xlane.f32.xlu1 %v619_v34 }
 0x668   :  { %v617_v35 = vpop.xlane.xlu0 %616 }
 0x669   :  { %v622_v37 = vmul.f32 0.5, %v617_v35 }
 0x66a   :  { %v621_v38 = vpop.xlane.xlu1 %620 }
 0x66b   :  { %v624_v40 = vmul.f32 %v622_v37, %v622_v37  ;;  %v623_v41 = vmul.f32 0.5, %v621_v38 }
 0x66d   :  { %v625_v36 = vsub.f32 %v623_v41, %v624_v40 }
 0x66f   :  { %v626_v42 = vmax.f32 %v625_v36, 0.0 }
 0x671   :  { %v627_v43 = vadd.f32 1e-05, %v626_v42 }
 0x673   :  { %901 = vrsqrt.f32 %v627_v43  ;;  %vm634_vm12 = vweird.f32 %v627_v43 }
 0x679   :  { %v902_v44 = vpop.eup %901 }
 0x67a   :  { %v629_v45 = vmul.f32 %v902_v44, %v627_v43  ;;  %vm635_vm11 = vweird.f32 %v902_v44 }
 0x67b   :  { %vm636_vm13 = vmor %vm634_vm12, %vm635_vm11 }
 0x67c   :  { %v630_v46 = vmul.f32 %v902_v44, %v629_v45 }
 0x67e   :  { %v631_v47 = vmul.f32 0.5, %v630_v46 }
 0x680   :  { %v632_v48 = vsub.f32 1.5, %v631_v47 }
 0x682   :  { %v633_v49 = vmul.f32 %v902_v44, %v632_v48 }
 0x684   :  { %v637_v5 = vsel %vm636_vm13, %v902_v44, %v633_v49 }
 0x685   :  { %v638_v52 = vmul.f32 %v637_v5, %v1143_v28 }
 0x687   :  { %v639_v53 = vmul.f32 %v638_v52, %v622_v37 }
 0x689   :  { %641 = vrot.lane.b32.xlu2 %v639_v53, %s1067_s2 }
 0x691   :  { %647 = vperm.xlu2 %893, %v638_v52  }
 0x699   :  { %894 = vset.pattern.permute.xlu2 %v1075_v54 }
 0x6e3   :  { %v642_v22 = vpop.permute.xlu2 %641 }
 0x6e4   :  { %v644_v56 = vsub.f32 %v1143_v28, %v642_v22 }
 0x6e6   :  { %653 = vperm.xlu2 %894, %v644_v56  }
 0x6eb   :  { %v648_v58 = vpop.permute.xlu2 %647 }
 0x6ec   :  { %v650_v59 = vmul.f32 %v648_v58, %v612_v31 }
 0x6ee   :  { %895 = vset.pattern.permute.xlu2 %v1076_v8 }
 0x6ef   :  { %659 = vperm.xlu2 %895, %v1143_v28   ;;  %v715_v28 = vrot.slane %v711_v10, 2 }
 0x740   :  { %v654_v30 = vpop.permute.xlu2 %653 }
 0x741   :  { %v656_v60 = vadd.f32 %v654_v30, %v650_v59 }
 0x743   :  { %v657_v61 = vmax.f32 %v656_v60, 0.0 }
 0x745   :  { %680 = vmatpush.msrb.mxu1 %v657_v61 }
 0x746   :  { %860 = vmatmul.msk.f32.vlgmr.msrb.gmra.mxu1 %vm590_vm9, %v103_v57 }
 0x747   :  { %867 = vmatpush.msk.msra.mxu1 %vm719_vm14, %v715_v28 }
 0x749   :  { %v660_v9 = vpop.permute.xlu2 %659 }
 0x7c3   :  { %v682_v12 = vpop.f32.mrf.mxu1 }
 0x7c4   :  { %v683_v14 = vadd.f32 %v682_v12, %v660_v9 }
 0x7c6   :  { %v685_v15 = vsub.f32 0.0, %v683_v14 }
 0x7c8   :  { %v686_v50 = vmul.f32 1.442695, %v685_v15 }
 0x7ca   :  { %903 = vpow2.f32 %v686_v50 }
 0x7d0   :  { %v904_v16 = vpop.eup %903 }
 0x7d1   :  { %v688_v17 = vadd.f32 1.0, %v904_v16 }
 0x7d3   :  { %905 = vrcp.f32 %v688_v17  ;;  %v700_v21 = vand.u32 2147483648, %v688_v17  ;;  %v698_v25 = vand.u32 2147483647, %v688_v17  ;;  %vm694_vm0 = vweird.f32 %v688_v17 }
 0x7d5   :  { %v701_v27 = vor.u32 1.1754944e-38, %v700_v21  ;;  %vm699_vm2 = vcmp.eq.f32.partialorder %v698_v25, 8.507059e+37 }
 0x7d9   :  { %v906_v18 = vpop.eup %905 }
 0x7da   :  { %v690_v19 = vmul.f32 %v906_v18, %v688_v17  ;;  %vm695_vm15 = vweird.f32 %v906_v18 }
 0x7db   :  { %vm696_vm1 = vmor %vm694_vm0, %vm695_vm15 }
 0x7dc   :  { %v691_v20 = vsub.f32 1.0, %v690_v19 }
 0x7de   :  { %v692_v23 = vmul.f32 %v906_v18, %v691_v20 }
 0x7e0   :  { %v693_v26 = vadd.f32 %v906_v18, %v692_v23 }
 0x7e2   :  { %v697_v31 = vsel %vm696_vm1, %v906_v18, %v693_v26 }
 0x7e3   :  { %v702_v32 = vsel %vm699_vm2, %v701_v27, %v697_v31 }
 0x7e4   :  { %v704_v33 = vmul.f32 %v702_v32, %v1276_v24 }
 0x7e6   :  { %862 = vmatmul.msk.f32.vlgmr.msrb.gmra.mxu2 %vm614_vm10, %v704_v33  ;;  %864 = vmatmul.msk.f32.vlgmr.msrb.gmra.mxu3 %vm614_vm10, %v704_v33 }
 0x7e7   :  { %866 = vmatmul.msk.f32.vlgmr.msra.gmra.mxu0 %vm614_vm10, %v704_v33  ;;  %868 = vmatmul.msk.f32.vlgmr.msra.gmra.mxu1 %vm614_vm10, %v704_v33 }
 0x864   :  { %v785_v34 = vpop.f32.mrf.mxu0  ;;  %v805_v35 = vpop.f32.mrf.mxu1 }
 0x865   :  { %v810_v37 = vsub.f32 0.0, %v785_v34  ;;  %v811_v38 = vsub.f32 0.0, %v805_v35 }
 0x867   :  { %v814_v39 = vmax.f32 %v1263_v4, %v810_v37  ;;  %v815_v40 = vmax.f32 %v1266_v11, %v811_v38 }
 0x869   :  { %v818_v41 = vmin.f32 %v814_v39, %v785_v34  ;;  %v819_v36 = vmin.f32 %v815_v40, %v805_v35  ;;  %v745_v42 = vpop.f32.mrf.mxu2  ;;  %v765_v24 = vpop.f32.mrf.mxu3 }
 0x86a   :  { %v808_v43 = vsub.f32 0.0, %v745_v42  ;;  %v809_v44 = vsub.f32 0.0, %v765_v24 }
 0x86b   :  { %v822_v45 = vsub.f32 %v1263_v4, %v818_v41  ;;  %v823_v46 = vsub.f32 %v1266_v11, %v819_v36 }
 0x86c   :  { %v812_v47 = vmax.f32 %v1269_v13, %v808_v43  ;;  %v813_v48 = vmax.f32 %v1271_v51, %v809_v44 }
 0x86d   :  { %v826_v49 = vadd.f32 %v822_v45, %v1127_v2  ;;  %v827_v5 = vadd.f32 %v823_v46, %v1135_v6 }
 0x86e   :  { %v816_v52 = vmin.f32 %v812_v47, %v745_v42  ;;  %v817_v53 = vmin.f32 %v813_v48, %v765_v24 }
 0x86f   :  { %830 = vst [vmem:[#allocation11 + $0x10] sm:$0xff] %v826_v49 }
 0x870   :  { %831 = vst [vmem:[#allocation11 + $0x18] sm:$0xff] %v827_v5  ;;  %v820_v54 = vsub.f32 %v1269_v13, %v816_v52  ;;  %v821_v22 = vsub.f32 %v1271_v51, %v817_v53 }
 0x872   :  { %v824_v4 = vadd.f32 %v820_v54, %v1123_v0  ;;  %v825_v2 = vadd.f32 %v821_v22, %v1125_v1 }
 0x874   :  { %828 = vst [vmem:[#allocation11] sm:$0xff] %v824_v4 }
 0x875   :  { %829 = vst [vmem:[#allocation11 + $0x8] sm:$0xff] %v825_v2 }
 0x876   :  { %842 = dma.vmem_to_hbm [thread:$0]  %s838_s19, 512, %s840_s22, [#allocation4]  }
 0x877   :  { %1057 = dma.done.wait [#allocation4], 512  }
 0x878   :  { %1058 = vsyncadd [#allocation4], 4294966784 }
 0x879   :  { %847 = vsyncpa [#allocation3], 1 }
 0x87a   :  { %848 = vsyncpa [#allocation6], 1 }
 0x87b   :  { %849 = vsyncpa [#allocation9], 1 }
 0x87c   :  { %850 = vsyncpa [#allocation4], 1 }

</bundles_post_ra>
